<compile_context>
chip_gen: v7x
topology: tpu7x:2x2x1
jax: 0.10.0
libtpu: 0.0.40
codegen_flags: <defaults>
</compile_context>

<pallas_src>
import jax
import jax.numpy as jnp
from jax import lax
from jax.experimental import pallas as pl
from jax.experimental.pallas import tpu as pltpu


def features_kernel(p_ref, w_ref, scale_ref, bias_ref, o_ref):
    # p_ref:     (HW, Kpad)   bf16 im2col patches for one batch element
    # w_ref:     (Kpad, Cpad) bf16 conv weights (tap-major K, zero-padded)
    # scale_ref: (1, Cpad)    f32 folded BN scale  (gamma / sqrt(var+eps))
    # bias_ref:  (1, Cpad)    f32 folded BN bias   (includes conv bias)
    # o_ref:     (1, 1, Cpad) f32 pooled features for this batch element
    hw = p_ref.shape[0]

    # Single im2col matmul on the MXU, f32 accumulation.
    acc = jnp.dot(p_ref[...], w_ref[...], preferred_element_type=jnp.float32)

    # Folded BatchNorm (eval mode) + ReLU on the VPU.
    y = acc * scale_ref[0, :] + bias_ref[0, :]
    y = jnp.maximum(y, 0.0)

    # AdaptiveAvgPool2d(1): sum over spatial positions * precomputed 1/(H*W).
    pooled = jnp.sum(y, axis=0) * (1.0 / hw)
    o_ref[...] = pooled.reshape(1, 1, -1)


def features_forward(x_nchw, w_taps, scale, bias, *, lane=128):
    """x_nchw: (B, Cin, H, W) f32 -> (B, Cout, 1, 1) f32."""
    B, Cin, H, W = x_nchw.shape
    Cout = w_taps.shape[-1]
    HW = H * W
    K = 9 * Cin
    Kpad = ((K + lane - 1) // lane) * lane
    Cpad = ((Cout + lane - 1) // lane) * lane

    # --- im2col in the wrapper (XLA handles the layout shuffles once) ---
    x = jnp.transpose(x_nchw, (0, 2, 3, 1))                       # NHWC
    xp = jnp.pad(x, ((0, 0), (1, 1), (1, 1), (0, 0)))             # pad=1
    taps = [xp[:, kh:kh + H, kw:kw + W, :]                        # tap-major
            for kh in range(3) for kw in range(3)]
    patches = jnp.concatenate(taps, axis=-1).reshape(B * HW, K)   # (B*HW, 9*Cin)
    patches = jnp.pad(patches, ((0, 0), (0, Kpad - K)))
    patches = patches.astype(jnp.bfloat16)                        # lane-dense bf16

    w2 = w_taps.reshape(K, Cout)
    w2 = jnp.pad(w2, ((0, Kpad - K), (0, Cpad - Cout))).astype(jnp.bfloat16)
    scale_p = jnp.pad(scale.reshape(1, Cout), ((0, 0), (0, Cpad - Cout)))
    bias_p = jnp.pad(bias.reshape(1, Cout), ((0, 0), (0, Cpad - Cout)))

    cost = pl.CostEstimate(
        flops=2 * B * HW * K * Cout,
        transcendentals=0,
        bytes_accessed=int(patches.size) * 2 + int(w2.size) * 2
                       + (Cpad * 4 * 2) + B * Cpad * 4)

    out = pl.pallas_call(
        features_kernel,
        out_shape=jax.ShapeDtypeStruct((B, 1, Cpad), jnp.float32),
        grid=(B,),
        in_specs=[
            pl.BlockSpec((HW, Kpad), lambda b: (b, 0)),     # per-batch patch slab
            pl.BlockSpec((Kpad, Cpad), lambda b: (0, 0)),   # shared weights
            pl.BlockSpec((1, Cpad), lambda b: (0, 0)),      # shared BN scale
            pl.BlockSpec((1, Cpad), lambda b: (0, 0)),      # shared BN bias
        ],
        out_specs=pl.BlockSpec((1, 1, Cpad), lambda b: (b, 0, 0)),
        compiler_params=pltpu.CompilerParams(
            dimension_semantics=("parallel",)),
        cost_estimate=cost,
    )(patches, w2, scale_p, bias_p)

    # Match PyTorch AdaptiveAvgPool2d(1) output shape: (B, Cout, 1, 1).
    return out[:, 0, :Cout].reshape(B, Cout, 1, 1)


def _reference(x_nchw, w_oihw, conv_b, gamma, beta, mean, var, eps):
    """Pure-JAX f32 reference for the feature extractor (conv+bn+relu+avgpool)."""
    y = lax.conv_general_dilated(
        x_nchw, w_oihw, window_strides=(1, 1), padding=((1, 1), (1, 1)),
        dimension_numbers=("NCHW", "OIHW", "NCHW"))
    y = y + conv_b[None, :, None, None]
    y = (y - mean[None, :, None, None]) / jnp.sqrt(var[None, :, None, None] + eps)
    y = y * gamma[None, :, None, None] + beta[None, :, None, None]
    y = jnp.maximum(y, 0.0)
    return jnp.mean(y, axis=(2, 3), keepdims=True)


if __name__ == "__main__":
    B, Cin, H, W, Cout = 2, 4, 16, 16, 32
    eps = 1e-5

    key = jax.random.PRNGKey(0)
    kx, kw, kb, kg, kbe, km, kv = jax.random.split(key, 7)

    x = jax.random.normal(kx, (B, Cin, H, W), jnp.float32)

    # Deterministic synthetic "pretrained" parameters.
    w_oihw = jax.random.normal(kw, (Cout, Cin, 3, 3), jnp.float32) * 0.1
    conv_b = jax.random.normal(kb, (Cout,), jnp.float32) * 0.1
    gamma = 1.0 + 0.1 * jax.random.normal(kg, (Cout,), jnp.float32)
    beta = 0.1 * jax.random.normal(kbe, (Cout,), jnp.float32)
    run_mean = 0.1 * jax.random.normal(km, (Cout,), jnp.float32)
    run_var = jnp.abs(1.0 + 0.1 * jax.random.normal(kv, (Cout,), jnp.float32))
    # (Linear head of the synthetic pretrained model is dropped by FeaturesModel.)

    # Fold BN (eval mode) and conv bias into per-channel scale/bias.
    scale = gamma / jnp.sqrt(run_var + eps)                       # (Cout,)
    bias = (conv_b - run_mean) * scale + beta                     # (Cout,)

    # Conv weights reorganized for the kernel: (Cout, Cin, 3, 3) -> (9, Cin, Cout),
    # tap-major (kh*3+kw) to match the wrapper's im2col concatenation order.
    w_taps = jnp.transpose(w_oihw, (2, 3, 1, 0)).reshape(9, Cin, Cout)

    out = features_forward(x, w_taps, scale, bias)
    out = jax.block_until_ready(out)

    ref = _reference(x, w_oihw, conv_b, gamma, beta, run_mean, run_var, eps)
    assert out.shape == (B, Cout, 1, 1)
    # bf16 MXU inputs with f32 accumulation -> slightly loosened tolerance.
    assert jnp.allclose(out, ref, atol=2e-2, rtol=2e-2), "mismatch vs JAX reference"

    print("KERNEL_OK")
</pallas_src>

<mosaic_0001>
module attributes {stable_mosaic.version = 11 : i64} {
  func.func @features_kernel(%arg0: i32, %arg1: memref<256x128xbf16, #tpu.memory_space<vmem>>, %arg2: memref<128x128xbf16, #tpu.memory_space<vmem>>, %arg3: memref<1x128xf32, #tpu.memory_space<vmem>>, %arg4: memref<1x128xf32, #tpu.memory_space<vmem>>, %arg5: memref<1x1x128xf32, #tpu.memory_space<vmem>>) attributes {dimension_semantics = [#tpu.dimension_semantics<parallel>], iteration_bounds = array<i64: 2>, scalar_prefetch = 0 : i64, scratch_operands = 0 : i64, tpu.core_type = #tpu.core_type<tc>, window_params = [{transform_indices = @transform_0, window_bounds = array<i64: 256, 128>}, {pipeline_mode = #tpu.pipeline_mode<synchronous>, transform_indices = @transform_1, window_bounds = array<i64: 128, 128>}, {pipeline_mode = #tpu.pipeline_mode<synchronous>, transform_indices = @transform_2, window_bounds = array<i64: 1, 128>}, {pipeline_mode = #tpu.pipeline_mode<synchronous>, transform_indices = @transform_3, window_bounds = array<i64: 1, 128>}, {transform_indices = @transform_4, window_bounds = array<i64: 1, 1, 128>}]} {
    %c0 = arith.constant 0 : index
    %c0_0 = arith.constant 0 : index
    %0 = vector.load %arg1[%c0, %c0_0] : memref<256x128xbf16, #tpu.memory_space<vmem>>, vector<256x128xbf16>
    %c0_1 = arith.constant 0 : index
    %c0_2 = arith.constant 0 : index
    %1 = vector.load %arg2[%c0_1, %c0_2] : memref<128x128xbf16, #tpu.memory_space<vmem>>, vector<128x128xbf16>
    %cst = arith.constant dense<0.000000e+00> : vector<256x128xf32>
    %2 = tpu.matmul %0, %1, %cst {dimension_numbers = #tpu.dot_dimension_numbers<[1], [0], [0], [1], [0, 0, 1, 1], [], []>} : vector<256x128xbf16>, vector<128x128xbf16>, vector<256x128xf32> -> vector<256x128xf32>
    %c0_3 = arith.constant 0 : index
    %c0_4 = arith.constant 0 : index
    %3 = vector.load %arg3[%c0_3, %c0_4] : memref<1x128xf32, #tpu.memory_space<vmem>>, vector<1x128xf32>
    %4 = vector.shape_cast %3 : vector<1x128xf32> to vector<128xf32>
    %5 = vector.shape_cast %4 : vector<128xf32> to vector<1x128xf32>
    %6 = vector.broadcast %5 : vector<1x128xf32> to vector<256x128xf32>
    %7 = arith.mulf %2, %6 : vector<256x128xf32>
    %c0_5 = arith.constant 0 : index
    %c0_6 = arith.constant 0 : index
    %8 = vector.load %arg4[%c0_5, %c0_6] : memref<1x128xf32, #tpu.memory_space<vmem>>, vector<1x128xf32>
    %9 = vector.shape_cast %8 : vector<1x128xf32> to vector<128xf32>
    %10 = vector.shape_cast %9 : vector<128xf32> to vector<1x128xf32>
    %11 = vector.broadcast %10 : vector<1x128xf32> to vector<256x128xf32>
    %12 = arith.addf %7, %11 : vector<256x128xf32>
    %cst_7 = arith.constant 0.000000e+00 : f32
    %13 = vector.broadcast %cst_7 : f32 to vector<256x128xf32>
    %14 = arith.maximumf %12, %13 : vector<256x128xf32>
    %cst_8 = arith.constant dense<0.000000e+00> : vector<128xf32>
    %15 = vector.multi_reduction <add>, %14, %cst_8 [0] : vector<256x128xf32> to vector<128xf32>
    %cst_9 = arith.constant 3.906250e-03 : f32
    %16 = vector.broadcast %cst_9 : f32 to vector<128xf32>
    %17 = arith.mulf %15, %16 : vector<128xf32>
    %18 = vector.shape_cast %17 : vector<128xf32> to vector<1x1x128xf32>
    %c0_10 = arith.constant 0 : index
    %c0_11 = arith.constant 0 : index
    %c0_12 = arith.constant 0 : index
    %19 = vector.load %arg5[%c0_10, %c0_11, %c0_12] : memref<1x1x128xf32, #tpu.memory_space<vmem>>, vector<1x1x128xf32>
    tpu.vector_store %arg5[%c0_10, %c0_11, %c0_12], %18 {strides = array<i32>} : memref<1x1x128xf32, #tpu.memory_space<vmem>>, vector<1x1x128xf32>,
    return
  }
  func.func @transform_0(%arg0: i32) -> (i32, i32) {
    %c0_i32 = arith.constant 0 : i32
    %c0_i32_0 = arith.constant 0 : i32
    return %arg0, %c0_i32 : i32, i32
  }
  func.func @transform_1(%arg0: i32) -> (i32, i32) {
    %c0_i32 = arith.constant 0 : i32
    %c0_i32_0 = arith.constant 0 : i32
    %c0_i32_1 = arith.constant 0 : i32
    return %c0_i32, %c0_i32_0 : i32, i32
  }
  func.func @transform_2(%arg0: i32) -> (i32, i32) {
    %c0_i32 = arith.constant 0 : i32
    %c0_i32_0 = arith.constant 0 : i32
    %c0_i32_1 = arith.constant 0 : i32
    return %c0_i32, %c0_i32_0 : i32, i32
  }
  func.func @transform_3(%arg0: i32) -> (i32, i32) {
    %c0_i32 = arith.constant 0 : i32
    %c0_i32_0 = arith.constant 0 : i32
    %c0_i32_1 = arith.constant 0 : i32
    return %c0_i32, %c0_i32_0 : i32, i32
  }
  func.func @transform_4(%arg0: i32) -> (i32, i32, i32) {
    %c0_i32 = arith.constant 0 : i32
    %c0_i32_0 = arith.constant 0 : i32
    %c0_i32_1 = arith.constant 0 : i32
    return %arg0, %c0_i32, %c0_i32_0 : i32, i32, i32
  }
}

</mosaic_0001>

<bundles_post_ra>
// kernel: tpu_custom_call.1
= control target key start
LH: loop header
LB: loop body
LE: loop exit
PB: predicated region body
PF: predicated region fallthrough
CT: control target
= control target key end

     0   :  { %9 = vsyncpa [#allocation3], 0  ;;  %s1537_s0 = inlined_call_operand.hbm [shape: bf16[512,128], index: 0, kind: input, shape index: {}]   ;;  %s1538_s1 = inlined_call_operand.hbm [shape: bf16[128,128], index: 1, kind: input, shape index: {}]   ;;  %s1539_s2 = inlined_call_operand.vmem [shape: f32[1,128], index: 2, kind: input, shape index: {}]   ;;  %s1540_s3 = inlined_call_operand.vmem [shape: f32[1,128], index: 3, kind: input, shape index: {}]   ;;  %s1541_s4 = inlined_call_operand.hbm [shape: f32[2,1,128], index: 4, kind: output, shape index: {}]  }
   0x1   :  { %11 = vsyncpa [#allocation3 + $0x1], 0 }
   0x2   :  { %12 = vsyncpa [#allocation6], 0 }
   0x3   :  { %13 = vsyncpa [#allocation4], 0 }
   0x4   :  { %15 = vsyncpa [#allocation4 + $0x1], 0  ;;  %s1194_s15 = smov 0   ;;  %s1196_s16 = smov 0  }
   0x5   :  { %s1198_s17 = smov 0   ;;  %s1200_s18 = smov 0  }
   0x6 LB: > { %s1215_s19 = sadd.s32 4294967295, %s1162_s18   ;;  %s823_s20 = sadd.s32 4294967294, %s1162_s18   ;;  %s1162_s18 = sphi %s1200_s18, %s1561_s18   ;;  %s1158_s17 = sphi %s1198_s17, %s1560_s17   ;;  %s1154_s16 = sphi %s1196_s16, %s1559_s16   ;;  %s1150_s15 = sphi %s1194_s15, %s1558_s15  }
   0x7   : > { %p41_p0 = scmp.ne.s32.totalorder %s1154_s16, %s1150_s15  ;;  %p1542_p1 = scmp.eq.s32.totalorder %s1215_s19, 0 }
   0x8   : > { %p134_p3 = scmp.eq.s32.totalorder %s823_s20, 1  ;;  %p824_p5 = scmp.ge.s32.totalorder %s1162_s18, 1 }
   0x9   : > { %p1224_p4 = por %p1542_p1, %p41_p0  ;;  %p141_p7 = scmp.lt.s32.totalorder %s1162_s18, 3 }
   0xa   : > { %p1229_p6 = por %p134_p3, %p41_p0  ;;  %s1164_s24 = smov [#allocation5]  }
   0xb   : > { %s1545_s21 = scalar_select %p1224_p4, 1, 0 }
   0xc   : > { %s1546_s22 = scalar_select %p1229_p6, 1, 0 }
   0xd   : > { %p1234_p8 = pnand %p824_p5, %p141_p7  ;;  %s153_s25 = sshll.u32 %s1164_s24, 4  ;;  %s1238_s25 = int_to_ptr.vmem [resolvable:$true] %s153_s25 }
   0xe   : > { %s1250_s27 = sadd.s32 1, %s1162_s18   ;;  %s28_s28 = sadd.s32 1, %s1158_s17 }
   0xf   : > { %s1547_s23 = scalar_select %p1234_p8, 1, 0 }
  0x10   : > { %p959_p9 = pneg %p1234_p8  ;;  %s25_s29 = ssub.s32 %s1162_s18, %s1250_s27 }
  0x11   : > { %s1034_s6 = scalar_lea.hbm %s1538_s1, 1024 }
  0x12   : > { %p1245_p11 = pnand %p959_p9, %p1542_p1  ;;  %p1035_p12 = scmp.ne.s32.totalorder %s1538_s1, %s1034_s6 }
  0x13   : > { %p1041_p5 = scmp.lt.u32.totalorder %s1034_s6, %s1538_s1 }
  0x14   : > { %p1036_p13 = pneg %p1245_p11 }
  0x16   : > { %p1037_p0 = pnand %p1036_p13, %p1035_p12 }
  0x18   : > { %p1038_p3 = pneg %p1037_p0 }
  0x1a   : > { %p1043_p7 = pnand %p1041_p5, %p1038_p3 }
  0x1c   : > { %1046 = shalt.err (!%p1043_p7)
}
  0x1d   : > { %s1047_s11 = scalar_lea.vmem %s1238_s25, 1024  ;;  %p1055_p2 = scmp.lt.s32.totalorder %s1238_s25, %s1238_s25 }
  0x1e   : > { %p1048_p9 = scmp.ne.s32.totalorder %s1238_s25, %s1047_s11  ;;  %p1056_p6 = scmp.lt.s32.totalorder %s1047_s11, %s1047_s11 }
  0x20   : > { %p1050_p10 = pnand %p1048_p9, %p1036_p13  ;;  %p1057_p4 = por %p1056_p6, %p1055_p2 }
  0x22   : > { %p1051_p1 = pneg %p1050_p10 }
  0x24   : > { %p1058_p8 = pnand %p1057_p4, %p1051_p1 }
  0x26   : > { %1061 = shalt.err (!%p1058_p8)
}
  0x27   : > { %s1165_s12 = smov 64   ;;  %s1166_s13 = smov 4  }
  0x28   : > { %962 = dma.hbm_to_vmem [thread:$0]  (!%p1245_p11), %s1538_s1, 1024, %s1238_s25, [#allocation6], %s1165_s12, %s1165_s12, %s1166_s13  }
  0x29   : > { %p26_p1 = scmp.eq.s32.totalorder %s25_s29, 0  ;;  %p35_p2 = scmp.ne.s32.totalorder %s1158_s17, %s1154_s16 }
  0x2a   : > { %p36_p4 = scmp.eq.s32.totalorder %s1162_s18, 0  ;;  %p972_p6 = scmp.lt.s32.totalorder %s1162_s18, 2 }
  0x2b   : > { %s1284_s24 = scalar_select %p26_p1, %s1158_s17, %s28_s28  }
  0x2c   : > { %p37_p8 = por %p36_p4, %p35_p2  ;;  %p1549_p10 = scmp.eq.s32.totalorder %s1215_s19, 1 }
  0x2d   : > { %s173_s26 = sand.u32 1, %s1158_s17   ;;  %s862_s5 = sshll.u32 %s1162_s18, 11 }
  0x2e   : > { %p1288_p12 = por %p1549_p10, %p35_p2  ;;  %s827_s6 = sshll.u32 %s173_s26, 7 }
  0x2f   : > { %s1297_s9 = scalar_lea.hbm %s1537_s0, %s862_s5  ;;  %s177_s25 = scalar_lea.vmem [#allocation2], %s827_s6 }
  0x30   : > { %s184_s28 = sshll.u32 %s177_s25, 4  ;;  %p1299_p11 = pnand %p972_p6, %p37_p8  ;;  %s1303_s28 = int_to_ptr.vmem [resolvable:$true] %s184_s28 }
  0x31   : > { %s1305_s10 = scalar_lea.sflag [#allocation3], %s173_s26  ;;  %s1062_s11 = scalar_lea.hbm %s1297_s9, 2048 }
  0x32   : > { %p1063_p13 = scmp.ne.s32.totalorder %s1297_s9, %s1062_s11  ;;  %p1064_p0 = pneg %p1299_p11 }
  0x33   : > { %s1067_s5 = scalar_lea.hbm %s1537_s0, 4096  ;;  %p1068_p7 = scmp.lt.u32.totalorder %s1297_s9, %s1537_s0 }
  0x34   : > { %p1065_p3 = pnand %p1064_p0, %p1063_p13  ;;  %p1069_p9 = scmp.lt.u32.totalorder %s1067_s5, %s1062_s11 }
  0x35   : > { %p1071_p2 = scmp.lt.u32.totalorder %s1062_s11, %s1297_s9 }
  0x36   : > { %p1066_p5 = pneg %p1065_p3  ;;  %p1070_p1 = por %p1069_p9, %p1068_p7 }
  0x38   : > { %p1072_p4 = por %p1071_p2, %p1070_p1 }
  0x3a   : > { %p1073_p6 = pnand %p1072_p4, %p1066_p5 }
  0x3c   : > { %1076 = shalt.err (!%p1073_p6)
}
  0x3d   : > { %s1077_s26 = scalar_lea.vmem %s1303_s28, 2048  ;;  %s1167_s8 = smov [#allocation2]  }
  0x3e   : > { %p1078_p8 = scmp.ne.s32.totalorder %s1303_s28, %s1077_s26  ;;  %s1082_s25 = sshll.u32 %s1167_s8, 4  ;;  %s1083_s25 = int_to_ptr.vmem [resolvable:$false] %s1082_s25 }
  0x3f   : > { %s1084_s14 = scalar_lea.vmem %s1083_s25, 4096  ;;  %p1085_p3 = scmp.lt.s32.totalorder %s1303_s28, %s1083_s25 }
  0x40   : > { %p1080_p10 = pnand %p1078_p8, %p1064_p0  ;;  %p1086_p7 = scmp.lt.s32.totalorder %s1084_s14, %s1077_s26 }
  0x42   : > { %p1081_p13 = pneg %p1080_p10  ;;  %p1087_p9 = por %p1086_p7, %p1085_p3 }
  0x44   : > { %p1088_p1 = pnand %p1087_p9, %p1081_p13 }
  0x46   : > { %1091 = shalt.err (!%p1088_p1)
}
  0x47   : > { %966 = dma.hbm_to_vmem [thread:$0]  (!%p1299_p11), %s1297_s9, 2048, %s1303_s28, %s1305_s10, %s1165_s12, %s1165_s12, %s1166_s13  }
  0x48   : > { %p1552_p0 = scmp.ne.s32.totalorder %s1547_s23, 0 }
  0x49   : > { %s1339_s11 = sand.u32 (!%p1552_p0), 1, %s1154_s16   ;;  %p1553_p5 = scmp.ne.s32.totalorder (!%p1552_p0), %s1545_s21, 0 }
  0x4a   : > { %196 = sbr.rel (%p1552_p0) target bundleno = 429 (0x1ad), region = 36  ;;  %s831_s20 = sshll.u32 (!%p1552_p0), %s1339_s11, 7 }
  0x4b   : > { %s199_s5 = scalar_lea.sflag (!%p1552_p0), [#allocation3], %s1339_s11  ;;  %s1343_s6 = scalar_lea.vmem (!%p1552_p0), [#allocation2], %s831_s20 }
  0x51   : > { %1137 = dma.done.wait (%p1553_p5), %s199_s5, 2048  }
  0x52   : > { %1139 = vsyncadd (%p1553_p5), %s199_s5, 4294965248  ;;  %p1554_p11 = scmp.eq.s32.totalorder %s1215_s19, 0 }
  0x54   : > { %1141 = dma.done.wait (%p1554_p11), [#allocation6], 1024   ;;  %p1555_p2 = pmov %p1554_p11 }
  0x55   : > { %v1010_v0 = vld [vmem:[#allocation5] sm:$0xff]   ;;  %v1011_v1 = vld [vmem:[#allocation5 + $0x8] sm:$0xff]   ;;  %v1012_v2 = vld [vmem:[#allocation5 + $0x10] sm:$0xff]   ;;  %s859_s9 = sshll.u32 %s1215_s19, 4  ;;  %s229_s28 = scalar_lea.vmem [#allocation7], %s1339_s11 }
  0x56   : > { %1143 = vsyncadd (%p1555_p2), [#allocation6], 4294966272  ;;  %887 = vmatprep.subr.bf16.mxu0 %v1010_v0  ;;  %935 = vmatprep.subr.bf16.mxu1 %v1010_v0  ;;  %v1013_v3 = vld [vmem:[#allocation5 + $0x18] sm:$0xff]   ;;  %v1018_v4 = vld [vmem:[%s1343_s6] sm:$0xff]   ;;  %s747_s29 = sshll.u32 %s229_s28, 4  ;;  %s1493_s26 = scalar_lea.hbm %s1541_s4, %s859_s9  ;;  %s1495_s29 = int_to_ptr.vmem [resolvable:$true] %s747_s29 }
  0x57   : > { %888 = vmatpush3.bf16.msra.mxu0 %v1010_v0  ;;  %943 = vmatpush3.bf16.msra.mxu1 %v1010_v0  ;;  %v1014_v5 = vld [vmem:[#allocation5 + $0x20] sm:$0xff]   ;;  %v1015_v6 = vld [vmem:[#allocation5 + $0x28] sm:$0xff]   ;;  %v1016_v8 = vld [vmem:[#allocation5 + $0x30] sm:$0xff]   ;;  %s735_s8 = scalar_lea.sflag [#allocation4], %s1339_s11  ;;  %s1092_s25 = scalar_lea.vmem %s1495_s29, 16 }
  0x58   : > { %889 = vmatprep.subr.bf16.mxu0 %v1011_v1  ;;  %936 = vmatprep.subr.bf16.mxu1 %v1011_v1  ;;  %v1026_v7 = vld [vmem:[%s1343_s6 + $0x40] sm:$0xff]   ;;  %v1017_v9 = vld [vmem:[#allocation5 + $0x38] sm:$0xff]   ;;  %v1019_v10 = vld [vmem:[%s1343_s6 + $0x8] sm:$0xff]   ;;  %p1093_p4 = scmp.ne.s32.totalorder %s1495_s29, %s1092_s25  ;;  %s1168_s19 = smov [#allocation7]  }
  0x59   : > { %903 = vmatprep.mubr.bf16.mxu0 %v1018_v4  ;;  %919 = vmatprep.mubr.bf16.mxu1 %v1026_v7  ;;  %v1027_v11 = vld [vmem:[%s1343_s6 + $0x48] sm:$0xff]   ;;  %v1020_v12 = vld [vmem:[%s1343_s6 + $0x10] sm:$0xff]   ;;  %v1021_v14 = vld [vmem:[%s1343_s6 + $0x18] sm:$0xff]   ;;  %s1096_s14 = sshll.u32 %s1168_s19, 4  ;;  %s1097_s14 = int_to_ptr.vmem [resolvable:$false] %s1096_s14 }
  0x5a   : > { %v1028_v13 = vld [vmem:[%s1343_s6 + $0x50] sm:$0xff]   ;;  %v1029_v15 = vld [vmem:[%s1343_s6 + $0x58] sm:$0xff]   ;;  %v1022_v16 = vld [vmem:[%s1343_s6 + $0x20] sm:$0xff]   ;;  %p1094_p6 = pnand %p1093_p4, %p1288_p12  ;;  %s1098_s20 = scalar_lea.vmem %s1097_s14, 32 }
  0x5b   : > { %890 = vmatpush3.bf16.msra.mxu0 %v1011_v1  ;;  %944 = vmatpush3.bf16.msra.mxu1 %v1011_v1  ;;  %v1030_v17 = vld [vmem:[%s1343_s6 + $0x60] sm:$0xff]   ;;  %v1023_v18 = vld [vmem:[%s1343_s6 + $0x28] sm:$0xff]   ;;  %v1024_v20 = vld [vmem:[%s1343_s6 + $0x30] sm:$0xff]   ;;  %p1099_p10 = scmp.lt.s32.totalorder %s1495_s29, %s1097_s14  ;;  %p1100_p13 = scmp.lt.s32.totalorder %s1098_s20, %s1092_s25 }
  0x5c   : > { %891 = vmatprep.subr.bf16.mxu0 %v1012_v2  ;;  %937 = vmatprep.subr.bf16.mxu1 %v1012_v2  ;;  %v1031_v19 = vld [vmem:[%s1343_s6 + $0x68] sm:$0xff]   ;;  %v1032_v21 = vld [vmem:[%s1343_s6 + $0x70] sm:$0xff]   ;;  %v1025_v22 = vld [vmem:[%s1343_s6 + $0x38] sm:$0xff]   ;;  %p1095_p8 = pneg %p1094_p6 }
  0x5d   : > { %v1033_v23 = vld [vmem:[%s1343_s6 + $0x78] sm:$0xff]   ;;  %v1372_v24 = vld [vmem:[%s1539_s2] ss:$0 sm:$0xff]  ;;  %p1101_p3 = por %p1100_p13, %p1099_p10 }
  0x5e   : > { %v1379_v27 = vld [vmem:[%s1540_s3] ss:$0 sm:$0xff] }
  0x5f   : > { %892 = vmatpush3.bf16.msra.mxu0 %v1012_v2  ;;  %945 = vmatpush3.bf16.msra.mxu1 %v1012_v2  ;;  %p1102_p7 = pnand %p1101_p3, %p1095_p8 }
  0x60   : > { %893 = vmatprep.subr.bf16.mxu0 %v1013_v3  ;;  %938 = vmatprep.subr.bf16.mxu1 %v1013_v3 }
  0x63   : > { %894 = vmatpush3.bf16.msra.mxu0 %v1013_v3  ;;  %946 = vmatpush3.bf16.msra.mxu1 %v1013_v3 }
  0x64   : > { %895 = vmatprep.subr.bf16.mxu0 %v1014_v5  ;;  %939 = vmatprep.subr.bf16.mxu1 %v1014_v5 }
  0x67   : > { %896 = vmatpush3.bf16.msra.mxu0 %v1014_v5  ;;  %947 = vmatpush3.bf16.msra.mxu1 %v1014_v5 }
  0x68   : > { %897 = vmatprep.subr.bf16.mxu0 %v1015_v6  ;;  %940 = vmatprep.subr.bf16.mxu1 %v1015_v6 }
  0x6b   : > { %898 = vmatpush3.bf16.msra.mxu0 %v1015_v6  ;;  %948 = vmatpush3.bf16.msra.mxu1 %v1015_v6 }
  0x6c   : > { %899 = vmatprep.subr.bf16.mxu0 %v1016_v8  ;;  %941 = vmatprep.subr.bf16.mxu1 %v1016_v8 }
  0x6f   : > { %900 = vmatpush3.bf16.msra.mxu0 %v1016_v8  ;;  %949 = vmatpush3.bf16.msra.mxu1 %v1016_v8 }
  0x70   : > { %901 = vmatprep.subr.bf16.mxu0 %v1017_v9  ;;  %942 = vmatprep.subr.bf16.mxu1 %v1017_v9 }
  0x73   : > { %902 = vmatpush3.bf16.msra.mxu0 %v1017_v9  ;;  %950 = vmatpush3.bf16.msra.mxu1 %v1017_v9 }
  0x76   : > { %904 = vmatmul.mubr.bf16.vlgmr.msra.gmra.mrb[0].mxu0 %v1019_v10  ;;  %920 = vmatmul.mubr.bf16.vlgmr.msra.gmra.mrb[0].mxu1 %v1027_v11 }
  0x77   : > { %907 = vmatprep.mubr.bf16.mxu0 %v1020_v12  ;;  %923 = vmatprep.mubr.bf16.mxu1 %v1028_v13 }
  0x7e   : > { %908 = vmatmul.mubr.bf16.gmra.mrb[4].mxu0 %v1021_v14  ;;  %924 = vmatmul.mubr.bf16.gmra.mrb[4].mxu1 %v1029_v15 }
  0x7f   : > { %911 = vmatprep.mubr.bf16.mxu0 %v1022_v16  ;;  %927 = vmatprep.mubr.bf16.mxu1 %v1030_v17 }
  0x86   : > { %912 = vmatmul.mubr.bf16.gmra.mrb[8].mxu0 %v1023_v18  ;;  %928 = vmatmul.mubr.bf16.gmra.mrb[8].mxu1 %v1031_v19 }
  0x87   : > { %915 = vmatprep.mubr.bf16.mxu0 %v1024_v20  ;;  %931 = vmatprep.mubr.bf16.mxu1 %v1032_v21 }
  0x8e   : > { %916 = vmatmul.mubr.bf16.gmra.mrb[12].mxu0 %v1025_v22  ;;  %932 = vmatmul.mubr.bf16.gmra.mrb[12].mxu1 %v1033_v23 }
 0x149   : > { %v905_v25 = vpop.f32.mrb[0].mxu0  ;;  %v1374_v26 = vpop.f32.mrb[0].mxu1 }
 0x14a   : > { %v458_v28 = vpop.f32.mrb[1].mxu0  ;;  %v1381_v29 = vpop.f32.mrb[1].mxu1  ;;  %v594_v30 = vmul.f32 %v905_v25, %v1372_v24 }
 0x14b   : > { %v592_v31 = vmul.f32 %v1372_v24, %v458_v28  ;;  %v906_v32 = vpop.f32.mrb[2].mxu0  ;;  %v1385_v33 = vpop.f32.mrb[2].mxu1 }
 0x14c   : > { %v595_v34 = vmul.f32 %v906_v32, %v1372_v24  ;;  %v461_v35 = vpop.f32.mrb[3].mxu0  ;;  %v1388_v36 = vpop.f32.mrb[3].mxu1  ;;  %v633_v39 = vadd.f32 %v1379_v27, %v594_v30 }
 0x14d   : > { %v631_v37 = vadd.f32 %v1379_v27, %v592_v31  ;;  %v593_v38 = vmul.f32 %v1372_v24, %v461_v35 }
 0x14e   : > { %v634_v41 = vadd.f32 %v1379_v27, %v595_v34  ;;  %v665_v48 = vmax.f32 %v633_v39, 0.0 }
 0x14f   : > { %v632_v40 = vadd.f32 %v1379_v27, %v593_v38  ;;  %v663_v42 = vmax.f32 %v631_v37, 0.0 }
 0x150   : > { %v666_v54 = vmax.f32 %v634_v41, 0.0 }
 0x151   : > { %v664_v43 = vmax.f32 %v632_v40, 0.0  ;;  %v909_v44 = vpop.f32.mrb[4].mxu0  ;;  %v1395_v45 = vpop.f32.mrb[4].mxu1 }
 0x152   : > { %v474_v46 = vpop.f32.mrb[5].mxu0  ;;  %v1397_v47 = vpop.f32.mrb[5].mxu1  ;;  %v598_v50 = vmul.f32 %v909_v44, %v1372_v24 }
 0x153   : > { %v695_v49 = vadd.f32 %v664_v43, %v663_v42  ;;  %v596_v51 = vmul.f32 %v1372_v24, %v474_v46  ;;  %v910_v52 = vpop.f32.mrb[6].mxu0  ;;  %v1401_v53 = vpop.f32.mrb[6].mxu1 }
 0x154   : > { %v477_v55 = vpop.f32.mrb[7].mxu0  ;;  %v1403_v56 = vpop.f32.mrb[7].mxu1  ;;  %v599_v59 = vmul.f32 %v910_v52, %v1372_v24  ;;  %v637_v61 = vadd.f32 %v1379_v27, %v598_v50 }
 0x155   : > { %v696_v57 = vadd.f32 %v695_v49, %v665_v48  ;;  %v635_v58 = vadd.f32 %v1379_v27, %v596_v51  ;;  %v597_v60 = vmul.f32 %v1372_v24, %v477_v55  ;;  %v608_v48 = vmul.f32 %v1372_v24, %v1381_v29 }
 0x156   : > { %v638_v2 = vadd.f32 %v1379_v27, %v599_v59  ;;  %v669_v8 = vmax.f32 %v637_v61, 0.0 }
 0x157   : > { %v667_v62 = vmax.f32 %v635_v58, 0.0  ;;  %v697_v63 = vadd.f32 %v696_v57, %v666_v54  ;;  %v636_v0 = vadd.f32 %v1379_v27, %v597_v60  ;;  %v647_v60 = vadd.f32 %v1379_v27, %v608_v48 }
 0x158   : > { %v670_v17 = vmax.f32 %v638_v2, 0.0  ;;  %v610_v2 = vmul.f32 %v1374_v26, %v1372_v24 }
 0x159   : > { %v698_v1 = vadd.f32 %v697_v63, %v667_v62  ;;  %v668_v3 = vmax.f32 %v636_v0, 0.0  ;;  %v913_v4 = vpop.f32.mrb[8].mxu0  ;;  %v1411_v5 = vpop.f32.mrb[8].mxu1  ;;  %v609_v63 = vmul.f32 %v1372_v24, %v1388_v36 }
 0x15a   : > { %v490_v6 = vpop.f32.mrb[9].mxu0  ;;  %v1413_v7 = vpop.f32.mrb[9].mxu1  ;;  %v602_v10 = vmul.f32 %v913_v4, %v1372_v24  ;;  %v611_v4 = vmul.f32 %v1385_v33, %v1372_v24 }
 0x15b   : > { %v699_v9 = vadd.f32 %v698_v1, %v668_v3  ;;  %v600_v11 = vmul.f32 %v1372_v24, %v490_v6  ;;  %v914_v12 = vpop.f32.mrb[10].mxu0  ;;  %v1417_v13 = vpop.f32.mrb[10].mxu1  ;;  %v679_v3 = vmax.f32 %v647_v60, 0.0 }
 0x15c   : > { %v603_v14 = vmul.f32 %v914_v12, %v1372_v24  ;;  %v493_v15 = vpop.f32.mrb[11].mxu0  ;;  %v1420_v16 = vpop.f32.mrb[11].mxu1  ;;  %v641_v21 = vadd.f32 %v1379_v27, %v602_v10  ;;  %v612_v10 = vmul.f32 %v1372_v24, %v1397_v47  ;;  %v650_v36 = vadd.f32 %v1379_v27, %v611_v4 }
 0x15d   : > { %v700_v18 = vadd.f32 %v699_v9, %v669_v8  ;;  %v639_v19 = vadd.f32 %v1379_v27, %v600_v11  ;;  %v601_v20 = vmul.f32 %v1372_v24, %v493_v15  ;;  %v648_v9 = vadd.f32 %v1379_v27, %v609_v63 }
 0x15e   : > { %v642_v28 = vadd.f32 %v1379_v27, %v603_v14  ;;  %v673_v38 = vmax.f32 %v641_v21, 0.0  ;;  %v649_v11 = vadd.f32 %v1379_v27, %v610_v2  ;;  %v651_v26 = vadd.f32 %v1379_v27, %v612_v10 }
 0x15f   : > { %v671_v22 = vmax.f32 %v639_v19, 0.0  ;;  %v701_v23 = vadd.f32 %v700_v18, %v670_v17  ;;  %v640_v25 = vadd.f32 %v1379_v27, %v601_v20  ;;  %v680_v15 = vmax.f32 %v648_v9, 0.0 }
 0x160   : > { %v674_v44 = vmax.f32 %v642_v28, 0.0  ;;  %v613_v17 = vmul.f32 %v1372_v24, %v1403_v56  ;;  %v681_v33 = vmax.f32 %v649_v11, 0.0  ;;  %v614_v19 = vmul.f32 %v1395_v45, %v1372_v24 }
 0x161   : > { %v702_v30 = vadd.f32 %v701_v23, %v671_v22  ;;  %v672_v31 = vmax.f32 %v640_v25, 0.0  ;;  %v917_v32 = vpop.f32.mrb[12].mxu0  ;;  %v1427_v34 = vpop.f32.mrb[12].mxu1  ;;  %v682_v20 = vmax.f32 %v650_v36, 0.0  ;;  %v615_v47 = vmul.f32 %v1401_v53, %v1372_v24 }
 0x162   : > { %v506_v35 = vpop.f32.mrb[13].mxu0  ;;  %v1429_v37 = vpop.f32.mrb[13].mxu1  ;;  %v606_v40 = vmul.f32 %v917_v32, %v1372_v24  ;;  %v683_v22 = vmax.f32 %v651_v26, 0.0  ;;  %v652_v23 = vadd.f32 %v1379_v27, %v613_v17  ;;  %v616_v25 = vmul.f32 %v1372_v24, %v1413_v7 }
 0x163   : > { %v703_v39 = vadd.f32 %v702_v30, %v672_v31  ;;  %v604_v41 = vmul.f32 %v1372_v24, %v506_v35  ;;  %v918_v42 = vpop.f32.mrb[14].mxu0  ;;  %v1433_v43 = vpop.f32.mrb[14].mxu1  ;;  %v653_v28 = vadd.f32 %v1379_v27, %v614_v19  ;;  %v654_v56 = vadd.f32 %v1379_v27, %v615_v47 }
 0x164   : > { %v509_v46 = vpop.f32.mrb[15].mxu0  ;;  %v573_v49 = vpop.f32.mrb[15].mxu1  ;;  %v607_v52 = vmul.f32 %v918_v42, %v1372_v24  ;;  %v645_v55 = vadd.f32 %v1379_v27, %v606_v40  ;;  %v684_v32 = vmax.f32 %v652_v23, 0.0  ;;  %v655_v45 = vadd.f32 %v1379_v27, %v616_v25 }
 0x165   : > { %v704_v50 = vadd.f32 %v703_v39, %v673_v38  ;;  %v643_v51 = vadd.f32 %v1379_v27, %v604_v41  ;;  %v605_v54 = vmul.f32 %v1372_v24, %v509_v46  ;;  %v617_v35 = vmul.f32 %v1372_v24, %v1420_v16 }
 0x166   : > { %v646_v62 = vadd.f32 %v1379_v27, %v607_v52  ;;  %v677_v0 = vmax.f32 %v645_v55, 0.0  ;;  %v685_v53 = vmax.f32 %v653_v28, 0.0  ;;  %v618_v39 = vmul.f32 %v1411_v5, %v1372_v24 }
 0x167   : > { %v675_v57 = vmax.f32 %v643_v51, 0.0  ;;  %v705_v58 = vadd.f32 %v704_v50, %v674_v44  ;;  %v644_v59 = vadd.f32 %v1379_v27, %v605_v54  ;;  %v686_v40 = vmax.f32 %v654_v56, 0.0 }
 0x168   : > { %v678_v6 = vmax.f32 %v646_v62, 0.0  ;;  %v619_v7 = vmul.f32 %v1417_v13, %v1372_v24  ;;  %v687_v42 = vmax.f32 %v655_v45, 0.0  ;;  %v656_v44 = vadd.f32 %v1379_v27, %v617_v35 }
 0x169   : > { %v706_v61 = vadd.f32 %v705_v58, %v675_v57  ;;  %v676_v29 = vmax.f32 %v644_v59, 0.0  ;;  %v620_v46 = vmul.f32 %v1372_v24, %v1429_v37  ;;  %v657_v48 = vadd.f32 %v1379_v27, %v618_v39 }
 0x16a   : > { %v658_v16 = vadd.f32 %v1379_v27, %v619_v7  ;;  %v688_v52 = vmax.f32 %v656_v44, 0.0  ;;  %v621_v54 = vmul.f32 %v1372_v24, %v573_v49  ;;  %v622_v57 = vmul.f32 %v1427_v34, %v1372_v24 }
 0x16b   : > { %v707_v1 = vadd.f32 %v706_v61, %v676_v29  ;;  %v659_v5 = vadd.f32 %v1379_v27, %v620_v46  ;;  %v689_v55 = vmax.f32 %v657_v48, 0.0  ;;  %v623_v37 = vmul.f32 %v1433_v43, %v1372_v24 }
 0x16c   : > { %v690_v58 = vmax.f32 %v658_v16, 0.0  ;;  %v660_v61 = vadd.f32 %v1379_v27, %v621_v54  ;;  %v661_v62 = vadd.f32 %v1379_v27, %v622_v57 }
 0x16d   : > { %v708_v8 = vadd.f32 %v707_v1, %v677_v0  ;;  %v691_v60 = vmax.f32 %v659_v5, 0.0  ;;  %v662_v49 = vadd.f32 %v1379_v27, %v623_v37 }
 0x16e   : > { %v692_v0 = vmax.f32 %v660_v61, 0.0  ;;  %v693_v1 = vmax.f32 %v661_v62, 0.0 }
 0x16f   : > { %v709_v12 = vadd.f32 %v708_v8, %v678_v6  ;;  %v694_v34 = vmax.f32 %v662_v49, 0.0 }
 0x171   : > { %v710_v14 = vadd.f32 %v709_v12, %v679_v3 }
 0x173   : > { %v711_v18 = vadd.f32 %v710_v14, %v680_v15 }
 0x175   : > { %v712_v21 = vadd.f32 %v711_v18, %v681_v33 }
 0x177   : > { %v713_v30 = vadd.f32 %v712_v21, %v682_v20 }
 0x179   : > { %v714_v31 = vadd.f32 %v713_v30, %v683_v22 }
 0x17b   : > { %v715_v38 = vadd.f32 %v714_v31, %v684_v32 }
 0x17d   : > { %v716_v41 = vadd.f32 %v715_v38, %v685_v53 }
 0x17f   : > { %v717_v50 = vadd.f32 %v716_v41, %v686_v40 }
 0x181   : > { %v718_v51 = vadd.f32 %v717_v50, %v687_v42 }
 0x183   : > { %v719_v13 = vadd.f32 %v718_v51, %v688_v52 }
 0x185   : > { %v720_v59 = vadd.f32 %v719_v13, %v689_v55 }
 0x187   : > { %v721_v29 = vadd.f32 %v720_v59, %v690_v58 }
 0x189   : > { %v722_v63 = vadd.f32 %v721_v29, %v691_v60 }
 0x18b   : > { %v723_v2 = vadd.f32 %v722_v63, %v692_v0 }
 0x18d   : > { %v724_v3 = vadd.f32 %v723_v2, %v693_v1 }
 0x18f   : > { %v725_v4 = vadd.f32 %v724_v3, %v694_v34 }
 0x191   : > { %v726_v6 = vrot.slane %v725_v4, 4 }
 0x193   : > { %v727_v24 = vadd.f32 %v726_v6, %v725_v4 }
 0x195   : > { %v728_v43 = vrot.slane %v727_v24, 2 }
 0x197   : > { %v729_v8 = vadd.f32 %v728_v43, %v727_v24 }
 0x199   : > { %v730_v9 = vrot.slane %v729_v8, 1 }
 0x19b   : > { %v731_v10 = vadd.f32 %v730_v9, %v729_v8 }
 0x19d   : > { %v732_v11 = vmul.f32 0.00390625, %v731_v10 }
 0x19f   : > { %733 = vst [vmem:[%s229_s28] sm:$0x1] %v732_v11 }
 0x1a0   : > { %1105 = shalt.err (!%p1102_p7)
}
 0x1a1   : > { %s1106_s11 = scalar_lea.hbm %s1493_s26, 16  ;;  %s1110_s21 = scalar_lea.hbm %s1541_s4, 32 }
 0x1a2   : > { %p1107_p9 = scmp.ne.s32.totalorder %s1493_s26, %s1106_s11  ;;  %p1111_p5 = scmp.lt.u32.totalorder %s1493_s26, %s1541_s4 }
 0x1a3   : > { %p1112_p11 = scmp.lt.u32.totalorder %s1110_s21, %s1106_s11  ;;  %p1114_p4 = scmp.lt.u32.totalorder %s1106_s11, %s1493_s26 }
 0x1a4   : > { %p1108_p1 = pnand %p1107_p9, %p1288_p12 }
 0x1a5   : > { %p1113_p2 = por %p1112_p11, %p1111_p5 }
 0x1a6   : > { %p1109_p0 = pneg %p1108_p1 }
 0x1a7   : > { %p1115_p6 = por %p1114_p4, %p1113_p2 }
 0x1a9   : > { %p1116_p8 = pnand %p1115_p6, %p1109_p0 }
 0x1ab   : > { %1119 = shalt.err (!%p1116_p8)
}
 0x1ac   : > { %957 = dma.vmem_to_hbm [thread:$0]  (%p1288_p12), %s1495_s29, 16, %s1493_s26, %s735_s8  }
 0x1ad PF: > { %s759_s13 = sand.u32 1, %s1150_s15   ;;  %p1556_p10 = scmp.ne.s32.totalorder %s1546_s22, 0 }
 0x1ae   : > { %p1557_p13 = scmp.ge.s32.totalorder %s1162_s18, 2  ;;  %s760_s9 = scalar_lea.sflag [#allocation4], %s759_s13 }
 0x1b0   : > { %p968_p3 = pnand %p1557_p13, %p1556_p10 }
 0x1b2   : > { %1145 = dma.done.wait (!%p968_p3), %s760_s9, 16  }
 0x1b3   : > { %1147 = vsyncadd (!%p968_p3), %s760_s9, 4294967280  ;;  %p18_p7 = scmp.ge.s32.totalorder %s1250_s27, 4   ;;  %s1558_s15 = smov %s1154_s16 }
 0x1b4   : > { %s1559_s16 = smov %s1158_s17  ;;  %s1560_s17 = smov %s1284_s24 }
 0x1b5   : > { %s1561_s18 = smov %s1250_s27  ;;  %20 = sbr.rel (!%p18_p7) target bundleno = 6 (0x6), region = 85 }
 0x1bc   :  { %764 = vsyncpa [#allocation3], 1 }
 0x1bd   :  { %766 = vsyncpa [#allocation3 + $0x1], 1 }
 0x1be   :  { %767 = vsyncpa [#allocation6], 1 }
 0x1bf   :  { %768 = vsyncpa [#allocation4], 1 }
 0x1c0   :  { %770 = vsyncpa [#allocation4 + $0x1], 1 }

</bundles_post_ra>
